<compile_context>
chip_gen: v7x
topology: tpu7x:2x2x1
jax: 0.10.0
libtpu: 0.0.40
codegen_flags: <defaults>
</compile_context>

<pallas_src>
import functools

import jax
import jax.numpy as jnp
from jax.experimental import pallas as pl
from jax.experimental.pallas import tpu as pltpu

LANE = 128     # TPU lane width: hidden / matmul-N dims are padded to this
SUBLANE = 8    # TPU sublane width: batch tiles are multiples of this


def _round_up(n, m):
    return ((n + m - 1) // m) * m


def _default_tanh_dtype():
    """bf16 tanh on chips with a bf16 EUP (v6e/v7x); f32 elsewhere (v5e etc.)."""
    try:
        kind = jax.devices()[0].device_kind.lower()
    except Exception:  # pragma: no cover - no devices during tracing tools
        return jnp.float32
    if "v6" in kind or "v7" in kind:
        return jnp.bfloat16
    return jnp.float32


def actor_kernel(x_ref, w1_ref, b1_ref, w2_ref, b2_ref, w3_ref, b3_ref,
                 mu_ref, *, matmul_dtype, tanh_dtype):
    """One batch tile of mu = fc3(tanh(fc2(tanh(fc1(x))))).

    Weights are (in, out), zero-padded to 128-lane widths and stored in
    `matmul_dtype` (bf16 by default); accumulation and bias adds are f32,
    tanh runs in `tanh_dtype`.  The padded MXU output is sliced in-register
    so only the first `action_size` lanes are stored.
    """
    x = x_ref[...].astype(matmul_dtype)

    z1 = jnp.dot(x, w1_ref[...], preferred_element_type=jnp.float32) + b1_ref[...]
    h1 = jnp.tanh(z1.astype(tanh_dtype)).astype(matmul_dtype)

    z2 = jnp.dot(h1, w2_ref[...], preferred_element_type=jnp.float32) + b2_ref[...]
    h2 = jnp.tanh(z2.astype(tanh_dtype)).astype(matmul_dtype)

    mu = jnp.dot(h2, w3_ref[...], preferred_element_type=jnp.float32) + b3_ref[...]
    # Store only the real action lanes (masked vst; output array is narrow).
    mu_ref[...] = mu[:, :mu_ref.shape[1]].astype(mu_ref.dtype)


def actor_forward(x, kparams, action_size, *, block_b=4096, tanh_dtype=None):
    """x: (B, state_size), f32 or bf16. kparams: padded params (pad_actor_params)."""
    w1, b1 = kparams["w1"], kparams["b1"]
    w2, b2 = kparams["w2"], kparams["b2"]
    w3, b3 = kparams["w3"], kparams["b3"]

    B, S = x.shape
    assert w1.shape[0] == S, "state_size mismatch between x and params"
    A = action_size
    assert w3.shape[1] >= A, "padded action dim smaller than action_size"
    matmul_dtype = w1.dtype
    if tanh_dtype is None:
        tanh_dtype = _default_tanh_dtype()

    # ---- batch tiling --------------------------------------------------
    Bp8 = _round_up(B, SUBLANE)
    tb = _round_up(max(min(block_b, Bp8), SUBLANE), SUBLANE)
    # v7x has 2 TensorCores: keep >= 2 grid steps so the "parallel" batch axis
    # can be split across them (costs one extra ~0.35us step on 1-TC chips).
    if Bp8 >= 2 * SUBLANE:
        tb = min(tb, _round_up(pl.cdiv(Bp8, 2), SUBLANE))
    # Cap the tile so double-buffered in/out tiles stay well under VMEM
    # (v7x has 64 MiB physical).
    row_bytes = 2 * (S * x.dtype.itemsize + A * 4)
    tb = min(tb, max(SUBLANE, (40 << 20) // row_bytes // SUBLANE * SUBLANE))
    # Prefer a tile that divides the sublane-rounded batch, so no padded copy
    # of x has to be materialized for a ragged last tile.
    if Bp8 % tb != 0:
        for cand in range(tb - SUBLANE, SUBLANE - 1, -SUBLANE):
            if Bp8 % cand == 0 and 2 * cand >= tb:
                tb = cand
                break
    Bp = _round_up(B, tb)
    if Bp != B:
        x = jnp.pad(x, ((0, Bp - B), (0, 0)))
    grid = (Bp // tb,)

    # ---- cost / compiler params ----------------------------------------
    Hp = w1.shape[1]
    Ap = w3.shape[1]
    param_bytes = sum(a.size * a.dtype.itemsize for a in (w1, b1, w2, b2, w3, b3))
    cost = pl.CostEstimate(
        flops=2 * Bp * (S * Hp + Hp * Hp + Hp * Ap),
        transcendentals=2 * Bp * Hp,
        bytes_accessed=x.size * x.dtype.itemsize + Bp * A * 4 + param_bytes)

    cp_kwargs = dict(dimension_semantics=("parallel",))
    vmem_need = 2 * (tb * S * x.dtype.itemsize + tb * A * 4) + 2 * param_bytes
    if vmem_need > (12 << 20):
        # Exceeds v5e's 16 MiB default scoped-VMEM headroom; raise the limit
        # (still well under v7x's 64 MiB physical VMEM).
        cp_kwargs["vmem_limit_bytes"] = min(2 * vmem_need, 48 << 20)
    compiler_params = pltpu.CompilerParams(**cp_kwargs)

    mu_p = pl.pallas_call(
        functools.partial(actor_kernel,
                          matmul_dtype=matmul_dtype, tanh_dtype=tanh_dtype),
        out_shape=jax.ShapeDtypeStruct((Bp, A), jnp.float32),
        grid=grid,
        in_specs=[
            pl.BlockSpec((tb, S), lambda i: (i, 0)),    # x: tiled over batch
            pl.BlockSpec(w1.shape, lambda i: (0, 0)),   # weights stay VMEM-resident
            pl.BlockSpec(b1.shape, lambda i: (0, 0)),
            pl.BlockSpec(w2.shape, lambda i: (0, 0)),
            pl.BlockSpec(b2.shape, lambda i: (0, 0)),
            pl.BlockSpec(w3.shape, lambda i: (0, 0)),
            pl.BlockSpec(b3.shape, lambda i: (0, 0)),
        ],
        out_specs=pl.BlockSpec((tb, A), lambda i: (i, 0)),   # narrow (real) width
        compiler_params=compiler_params,
        cost_estimate=cost,
    )(x, w1, b1, w2, b2, w3, b3)

    mu = mu_p[:B] if Bp != B else mu_p
    # std = exp(zeros_like(mu)) == ones -> constant, produced outside the kernel.
    std = jnp.ones_like(mu)
    return mu, std


def init_actor_params(key, state_size, hidden_size, action_size):
    """f32 params mimicking nn.Linear's U(-1/sqrt(fan_in), +1/sqrt(fan_in)).
    Weights stored transposed: (in_features, out_features); biases (1, out)."""
    keys = jax.random.split(key, 6)

    def linear(kw, kb, fan_in, fan_out):
        bound = 1.0 / jnp.sqrt(jnp.float32(fan_in))
        w = jax.random.uniform(kw, (fan_in, fan_out), jnp.float32, -bound, bound)
        b = jax.random.uniform(kb, (1, fan_out), jnp.float32, -bound, bound)
        return w, b

    w1, b1 = linear(keys[0], keys[1], state_size, hidden_size)
    w2, b2 = linear(keys[2], keys[3], hidden_size, hidden_size)
    w3, b3 = linear(keys[4], keys[5], hidden_size, action_size)
    return {"w1": w1, "b1": b1, "w2": w2, "b2": b2, "w3": w3, "b3": b3}


def pad_actor_params(params, matmul_dtype=jnp.bfloat16):
    """Zero-pad hidden/action dims to 128 lanes; cast weights to matmul dtype."""
    w1, b1, w2, b2, w3, b3 = (params[k] for k in ("w1", "b1", "w2", "b2", "w3", "b3"))
    S, H = w1.shape
    A = w3.shape[1]
    Hp = _round_up(H, LANE)
    Ap = _round_up(A, LANE)

    def pad(a, shape):
        return jnp.pad(a, [(0, t - d) for t, d in zip(shape, a.shape)])

    return {
        "w1": pad(w1, (S, Hp)).astype(matmul_dtype),
        "b1": pad(b1, (1, Hp)).astype(jnp.float32),
        "w2": pad(w2, (Hp, Hp)).astype(matmul_dtype),
        "b2": pad(b2, (1, Hp)).astype(jnp.float32),
        "w3": pad(w3, (Hp, Ap)).astype(matmul_dtype),
        "b3": pad(b3, (1, Ap)).astype(jnp.float32),
    }


if __name__ == "__main__":
    # Small shapes consistent with the module: batch=8, state=16, hidden=32, action=8
    batch, state_size, hidden_size, action_size = 8, 16, 32, 8

    key = jax.random.PRNGKey(0)
    pkey, xkey, xkey2 = jax.random.split(key, 3)
    params_f32 = init_actor_params(pkey, state_size, hidden_size, action_size)
    kparams = pad_actor_params(params_f32, matmul_dtype=jnp.bfloat16)

    fwd = jax.jit(actor_forward, static_argnames=("action_size", "block_b", "tanh_dtype"))

    x = jax.random.normal(xkey, (batch, state_size), jnp.float32)
    mu, std = fwd(x, kparams, action_size=action_size)
    jax.block_until_ready((mu, std))

    # --- references (plain JAX) ---
    tanh_dtype = _default_tanh_dtype()

    def ref_exact(xa, p):
        # Same arithmetic as the kernel: bf16 operands, f32 accumulation,
        # tanh in the chip-dependent dtype.
        dt = jnp.bfloat16
        dot = lambda a, b: jnp.dot(a.astype(dt), b.astype(dt),
                                   preferred_element_type=jnp.float32)
        h1 = jnp.tanh((dot(xa, p["w1"]) + p["b1"]).astype(tanh_dtype)).astype(jnp.float32)
        h2 = jnp.tanh((dot(h1, p["w2"]) + p["b2"]).astype(tanh_dtype)).astype(jnp.float32)
        return dot(h2, p["w3"]) + p["b3"]

    def ref_f32(xa, p):
        h1 = jnp.tanh(xa @ p["w1"] + p["b1"])
        h2 = jnp.tanh(h1 @ p["w2"] + p["b2"])
        return h2 @ p["w3"] + p["b3"]

    mu_ref = ref_exact(x, params_f32)
    mu_ref32 = ref_f32(x, params_f32)

    assert mu.shape == (batch, action_size) and std.shape == (batch, action_size)
    # Tight check against the matching bf16-operand reference.
    assert jnp.allclose(mu, mu_ref, atol=3e-3, rtol=3e-3), "mismatch vs bf16 reference"
    # Loose check against the pure-f32 PyTorch-equivalent math.
    assert jnp.allclose(mu, mu_ref32, atol=6e-2, rtol=6e-2), "mismatch vs f32 reference"
    assert jnp.all(std == 1.0)

    # Ragged bigger batch: multi-step grid (>= 2 tiles so v7x can use both TCs).
    big_batch = 1000
    xb = jax.random.normal(xkey2, (big_batch, state_size), jnp.float32)
    mu_b, std_b = fwd(xb, kparams, action_size=action_size)
    jax.block_until_ready((mu_b, std_b))
    assert mu_b.shape == (big_batch, action_size)
    assert jnp.allclose(mu_b, ref_exact(xb, params_f32), atol=3e-3, rtol=3e-3)
    assert jnp.all(std_b == 1.0)

    # Small explicit tile: exercises the divisor-snapped (no-pad-copy) grid path.
    mu_c, _ = fwd(xb, kparams, action_size=action_size, block_b=128)
    jax.block_until_ready(mu_c)
    assert jnp.allclose(mu_c, mu_b, atol=1e-5, rtol=1e-5)

    print("KERNEL_OK")
</pallas_src>

<mosaic_0001>
module attributes {stable_mosaic.version = 11 : i64} {
  func.func @actor_kernel(%arg0: i32, %arg1: memref<8x16xf32, #tpu.memory_space<vmem>>, %arg2: memref<16x128xbf16, #tpu.memory_space<vmem>>, %arg3: memref<1x128xf32, #tpu.memory_space<vmem>>, %arg4: memref<128x128xbf16, #tpu.memory_space<vmem>>, %arg5: memref<1x128xf32, #tpu.memory_space<vmem>>, %arg6: memref<128x128xbf16, #tpu.memory_space<vmem>>, %arg7: memref<1x128xf32, #tpu.memory_space<vmem>>, %arg8: memref<8x8xf32, #tpu.memory_space<vmem>>) attributes {dimension_semantics = [#tpu.dimension_semantics<parallel>], iteration_bounds = array<i64: 1>, scalar_prefetch = 0 : i64, scratch_operands = 0 : i64, tpu.core_type = #tpu.core_type<tc>, window_params = [{transform_indices = @transform_0, window_bounds = array<i64: 8, 16>}, {pipeline_mode = #tpu.pipeline_mode<synchronous>, transform_indices = @transform_1, window_bounds = array<i64: 16, 128>}, {pipeline_mode = #tpu.pipeline_mode<synchronous>, transform_indices = @transform_2, window_bounds = array<i64: 1, 128>}, {pipeline_mode = #tpu.pipeline_mode<synchronous>, transform_indices = @transform_3, window_bounds = array<i64: 128, 128>}, {pipeline_mode = #tpu.pipeline_mode<synchronous>, transform_indices = @transform_4, window_bounds = array<i64: 1, 128>}, {pipeline_mode = #tpu.pipeline_mode<synchronous>, transform_indices = @transform_5, window_bounds = array<i64: 128, 128>}, {pipeline_mode = #tpu.pipeline_mode<synchronous>, transform_indices = @transform_6, window_bounds = array<i64: 1, 128>}, {transform_indices = @transform_7, window_bounds = array<i64: 8, 8>}]} {
    %c0 = arith.constant 0 : index
    %c0_0 = arith.constant 0 : index
    %0 = vector.load %arg1[%c0, %c0_0] : memref<8x16xf32, #tpu.memory_space<vmem>>, vector<8x16xf32>
    %1 = arith.truncf %0 : vector<8x16xf32> to vector<8x16xbf16>
    %c0_1 = arith.constant 0 : index
    %c0_2 = arith.constant 0 : index
    %2 = vector.load %arg2[%c0_1, %c0_2] : memref<16x128xbf16, #tpu.memory_space<vmem>>, vector<16x128xbf16>
    %cst = arith.constant dense<0.000000e+00> : vector<8x128xf32>
    %3 = tpu.matmul %1, %2, %cst {dimension_numbers = #tpu.dot_dimension_numbers<[1], [0], [0], [1], [0, 0, 1, 1], [], []>} : vector<8x16xbf16>, vector<16x128xbf16>, vector<8x128xf32> -> vector<8x128xf32>
    %c0_3 = arith.constant 0 : index
    %c0_4 = arith.constant 0 : index
    %4 = vector.load %arg3[%c0_3, %c0_4] : memref<1x128xf32, #tpu.memory_space<vmem>>, vector<1x128xf32>
    %5 = vector.broadcast %4 : vector<1x128xf32> to vector<8x128xf32>
    %6 = arith.addf %3, %5 : vector<8x128xf32>
    %7 = math.tanh %6 : vector<8x128xf32>
    %8 = arith.truncf %7 : vector<8x128xf32> to vector<8x128xbf16>
    %c0_5 = arith.constant 0 : index
    %c0_6 = arith.constant 0 : index
    %9 = vector.load %arg4[%c0_5, %c0_6] : memref<128x128xbf16, #tpu.memory_space<vmem>>, vector<128x128xbf16>
    %cst_7 = arith.constant dense<0.000000e+00> : vector<8x128xf32>
    %10 = tpu.matmul %8, %9, %cst_7 {dimension_numbers = #tpu.dot_dimension_numbers<[1], [0], [0], [1], [0, 0, 1, 1], [], []>} : vector<8x128xbf16>, vector<128x128xbf16>, vector<8x128xf32> -> vector<8x128xf32>
    %c0_8 = arith.constant 0 : index
    %c0_9 = arith.constant 0 : index
    %11 = vector.load %arg5[%c0_8, %c0_9] : memref<1x128xf32, #tpu.memory_space<vmem>>, vector<1x128xf32>
    %12 = vector.broadcast %11 : vector<1x128xf32> to vector<8x128xf32>
    %13 = arith.addf %10, %12 : vector<8x128xf32>
    %14 = math.tanh %13 : vector<8x128xf32>
    %15 = arith.truncf %14 : vector<8x128xf32> to vector<8x128xbf16>
    %c0_10 = arith.constant 0 : index
    %c0_11 = arith.constant 0 : index
    %16 = vector.load %arg6[%c0_10, %c0_11] : memref<128x128xbf16, #tpu.memory_space<vmem>>, vector<128x128xbf16>
    %cst_12 = arith.constant dense<0.000000e+00> : vector<8x128xf32>
    %17 = tpu.matmul %15, %16, %cst_12 {dimension_numbers = #tpu.dot_dimension_numbers<[1], [0], [0], [1], [0, 0, 1, 1], [], []>} : vector<8x128xbf16>, vector<128x128xbf16>, vector<8x128xf32> -> vector<8x128xf32>
    %c0_13 = arith.constant 0 : index
    %c0_14 = arith.constant 0 : index
    %18 = vector.load %arg7[%c0_13, %c0_14] : memref<1x128xf32, #tpu.memory_space<vmem>>, vector<1x128xf32>
    %19 = vector.broadcast %18 : vector<1x128xf32> to vector<8x128xf32>
    %20 = arith.addf %17, %19 : vector<8x128xf32>
    %21 = vector.extract_strided_slice %20 {offsets = [0, 0], sizes = [8, 8], strides = [1, 1]} : vector<8x128xf32> to vector<8x8xf32>
    %c0_15 = arith.constant 0 : index
    %c0_16 = arith.constant 0 : index
    %22 = vector.load %arg8[%c0_15, %c0_16] : memref<8x8xf32, #tpu.memory_space<vmem>>, vector<8x8xf32>
    tpu.vector_store %arg8[%c0_15, %c0_16], %21 {strides = array<i32>} : memref<8x8xf32, #tpu.memory_space<vmem>>, vector<8x8xf32>,
    return
  }
  func.func @transform_0(%arg0: i32) -> (i32, i32) {
    %c0_i32 = arith.constant 0 : i32
    %c0_i32_0 = arith.constant 0 : i32
    return %arg0, %c0_i32 : i32, i32
  }
  func.func @transform_1(%arg0: i32) -> (i32, i32) {
    %c0_i32 = arith.constant 0 : i32
    %c0_i32_0 = arith.constant 0 : i32
    %c0_i32_1 = arith.constant 0 : i32
    return %c0_i32, %c0_i32_0 : i32, i32
  }
  func.func @transform_2(%arg0: i32) -> (i32, i32) {
    %c0_i32 = arith.constant 0 : i32
    %c0_i32_0 = arith.constant 0 : i32
    %c0_i32_1 = arith.constant 0 : i32
    return %c0_i32, %c0_i32_0 : i32, i32
  }
  func.func @transform_3(%arg0: i32) -> (i32, i32) {
    %c0_i32 = arith.constant 0 : i32
    %c0_i32_0 = arith.constant 0 : i32
    %c0_i32_1 = arith.constant 0 : i32
    return %c0_i32, %c0_i32_0 : i32, i32
  }
  func.func @transform_4(%arg0: i32) -> (i32, i32) {
    %c0_i32 = arith.constant 0 : i32
    %c0_i32_0 = arith.constant 0 : i32
    %c0_i32_1 = arith.constant 0 : i32
    return %c0_i32, %c0_i32_0 : i32, i32
  }
  func.func @transform_5(%arg0: i32) -> (i32, i32) {
    %c0_i32 = arith.constant 0 : i32
    %c0_i32_0 = arith.constant 0 : i32
    %c0_i32_1 = arith.constant 0 : i32
    return %c0_i32, %c0_i32_0 : i32, i32
  }
  func.func @transform_6(%arg0: i32) -> (i32, i32) {
    %c0_i32 = arith.constant 0 : i32
    %c0_i32_0 = arith.constant 0 : i32
    %c0_i32_1 = arith.constant 0 : i32
    return %c0_i32, %c0_i32_0 : i32, i32
  }
  func.func @transform_7(%arg0: i32) -> (i32, i32) {
    %c0_i32 = arith.constant 0 : i32
    %c0_i32_0 = arith.constant 0 : i32
    return %arg0, %c0_i32 : i32, i32
  }
}

</mosaic_0001>

<bundles_post_ra>
// kernel: actor_forward.1
= control target key start
LH: loop header
LB: loop body
LE: loop exit
PB: predicated region body
PF: predicated region fallthrough
CT: control target
= control target key end

     0   :  { %12 = vsyncpa [#allocation3], 0  ;;  %s719_s0 = inlined_call_operand.hbm [shape: f32[8,16], index: 0, kind: input, shape index: {}]   ;;  %s720_s1 = inlined_call_operand.vmem [shape: bf16[16,128], index: 1, kind: input, shape index: {}]   ;;  %s721_s2 = inlined_call_operand.vmem [shape: f32[1,128], index: 2, kind: input, shape index: {}]   ;;  %s722_s3 = inlined_call_operand.hbm [shape: bf16[128,128], index: 3, kind: input, shape index: {}]   ;;  %s723_s4 = inlined_call_operand.vmem [shape: f32[1,128], index: 4, kind: input, shape index: {}]   ;;  %s724_s5 = inlined_call_operand.hbm [shape: bf16[128,128], index: 5, kind: input, shape index: {}]   ;;  %s725_s6 = inlined_call_operand.vmem [shape: f32[1,128], index: 6, kind: input, shape index: {}]   ;;  %s726_s7 = inlined_call_operand.hbm [shape: f32[8,8], index: 7, kind: output, shape index: {}]  }
   0x1   :  { %13 = vsyncpa [#allocation6], 0 }
   0x2   :  { %14 = vsyncpa [#allocation4], 0  ;;  %s582_s24 = smov [#allocation5]   ;;  %s488_s28 = scalar_lea.hbm %s722_s3, 1024 }
   0x3   :  { %s34_s25 = sshll.u32 %s582_s24, 4  ;;  %p489_p0 = scmp.ne.s32.totalorder %s722_s3, %s488_s28  ;;  %s35_s25 = int_to_ptr.vmem [resolvable:$true] %s34_s25 }
   0x4   :  { %p492_p1 = scmp.lt.u32.totalorder %s488_s28, %s722_s3 }
   0x6   :  { %p494_p2 = pnand %p492_p1, %p489_p0 }
   0x8   :  { %497 = shalt.err (!%p494_p2)
}
   0x9   :  { %s498_s10 = scalar_lea.vmem %s35_s25, 1024  ;;  %p503_p4 = scmp.lt.s32.totalorder %s35_s25, %s35_s25 }
   0xa   :  { %p499_p3 = scmp.ne.s32.totalorder %s35_s25, %s498_s10  ;;  %p504_p5 = scmp.lt.s32.totalorder %s498_s10, %s498_s10 }
   0xc   :  { %p505_p6 = por %p504_p5, %p503_p4 }
   0xe   :  { %p506_p7 = pnand %p505_p6, %p499_p3 }
  0x10   :  { %509 = shalt.err (!%p506_p7)
}
  0x11   :  { %s583_s11 = smov 64   ;;  %s584_s12 = smov 4  }
  0x12   :  { %40 = dma.hbm_to_vmem [thread:$0]  %s722_s3, 1024, %s35_s25, [#allocation6], %s583_s11, %s583_s11, %s584_s12  }
  0x13   :  { %s585_s15 = smov [#allocation2]   ;;  %s586_s17 = smov [#allocation7]  }
  0x14   :  { %s21_s16 = sshll.u32 %s585_s15, 4  ;;  %s48_s18 = sshll.u32 %s586_s17, 4  ;;  %s22_s16 = int_to_ptr.vmem [resolvable:$true] %s21_s16  ;;  %s49_s18 = int_to_ptr.vmem [resolvable:$true] %s48_s18 }
  0x15   :  { %s510_s21 = scalar_lea.hbm %s719_s0, 128 }
  0x16   :  { %p511_p8 = scmp.ne.s32.totalorder %s719_s0, %s510_s21  ;;  %p514_p9 = scmp.lt.u32.totalorder %s510_s21, %s719_s0 }
  0x18   :  { %p516_p10 = pnand %p514_p9, %p511_p8 }
  0x1a   :  { %519 = shalt.err (!%p516_p10)
}
  0x1b   :  { %s520_s3 = scalar_lea.vmem %s22_s16, 128  ;;  %p525_p12 = scmp.lt.s32.totalorder %s22_s16, %s22_s16 }
  0x1c   :  { %p521_p11 = scmp.ne.s32.totalorder %s22_s16, %s520_s3  ;;  %p526_p13 = scmp.lt.s32.totalorder %s520_s3, %s520_s3 }
  0x1e   :  { %p527_p0 = por %p526_p13, %p525_p12 }
  0x20   :  { %p528_p1 = pnand %p527_p0, %p521_p11 }
  0x22   :  { %531 = shalt.err (!%p528_p1)
}
  0x23   :  { %24 = dma.hbm_to_vmem [thread:$0]  %s719_s0, 128, %s22_s16, [#allocation3]  }
  0x24   :  { %s532_s30 = scalar_lea.hbm %s724_s5, 1024 }
  0x25   :  { %p533_p2 = scmp.ne.s32.totalorder %s724_s5, %s532_s30  ;;  %p536_p3 = scmp.lt.u32.totalorder %s532_s30, %s724_s5 }
  0x27   :  { %p538_p4 = pnand %p536_p3, %p533_p2 }
  0x29   :  { %541 = shalt.err (!%p538_p4)
}
  0x2a   :  { %s542_s14 = scalar_lea.vmem %s49_s18, 1024  ;;  %p547_p6 = scmp.lt.s32.totalorder %s49_s18, %s49_s18 }
  0x2b   :  { %p543_p5 = scmp.ne.s32.totalorder %s49_s18, %s542_s14  ;;  %p548_p7 = scmp.lt.s32.totalorder %s542_s14, %s542_s14 }
  0x2d   :  { %p549_p8 = por %p548_p7, %p547_p6 }
  0x2f   :  { %p550_p9 = pnand %p549_p8, %p543_p5 }
  0x31   :  { %553 = shalt.err (!%p550_p9)
}
  0x32   :  { %54 = dma.hbm_to_vmem [thread:$0]  %s724_s5, 1024, %s49_s18, [#allocation6], %s583_s11, %s583_s11, %s584_s12  }
  0x33   :  { %576 = dma.done.wait [#allocation3], 128  }
  0x34   :  { %577 = vsyncadd [#allocation3], 4294967168 }
  0x35   :  { %578 = dma.done.wait [#allocation6], 2048  }
  0x36   :  { %579 = vsyncadd [#allocation6], 4294965248  ;;  %v587_v0 = vmov 0.0   ;;  %vm588_vm0 = vmmov 0   ;;  %v467_v1 = vld [vmem:[%s720_s1] sm:$0xff]   ;;  %vm84_vm1 = vcmask 130048  }
  0x37   :  { %413 = vmatprep.subr.bf16.mxu0 %v587_v0  ;;  %415 = vmatprep.mubr.msk.bf16.mxu0 %vm588_vm0, %v587_v0  ;;  %v67_v2 = vld [vmem:[#allocation2] sm:$0xff]  ;;  %v468_v4 = vld [vmem:[#allocation5] sm:$0xff]   ;;  %v469_v5 = vld [vmem:[#allocation5 + $0x8] sm:$0xff]   ;;  %s589_s19 = smov [#allocation8]   ;;  %vm354_vm2 = vcmask 64512  }
  0x38   :  { %419 = vmatprep.subr.bf16.mxu1 %v587_v0  ;;  %435 = vmatprep.mubr.msk.bf16.mxu1 %vm588_vm0, %v587_v0  ;;  %v68_v3 = vpack.c.bf16 %v67_v2, %v67_v2  ;;  %v470_v6 = vld [vmem:[#allocation5 + $0x10] sm:$0xff]   ;;  %v471_v7 = vld [vmem:[#allocation5 + $0x18] sm:$0xff]   ;;  %v472_v8 = vld [vmem:[#allocation5 + $0x20] sm:$0xff]   ;;  %s362_s20 = sshll.u32 %s589_s19, 4  ;;  %s363_s20 = int_to_ptr.vmem [resolvable:$true] %s362_s20 }
  0x39   :  { %414 = vmatpush3.bf16.msra.mxu0 %v467_v1  ;;  %420 = vmatpush3.bf16.msra.mxu1 %v468_v4  ;;  %v473_v9 = vld [vmem:[#allocation5 + $0x28] sm:$0xff]   ;;  %v474_v10 = vld [vmem:[#allocation5 + $0x30] sm:$0xff]   ;;  %v475_v11 = vld [vmem:[#allocation5 + $0x38] sm:$0xff]   ;;  %p559_p11 = scmp.lt.s32.totalorder %s363_s20, %s363_s20 }
  0x3a   :  { %439 = vmatprep.subr.bf16.mxu0 %v587_v0  ;;  %421 = vmatprep.subr.bf16.mxu1 %v587_v0  ;;  %v476_v12 = vld [vmem:[#allocation7] sm:$0xff]   ;;  %v477_v13 = vld [vmem:[#allocation7 + $0x8] sm:$0xff]   ;;  %v478_v14 = vld [vmem:[#allocation7 + $0x10] sm:$0xff]  }
  0x3b   :  { %v479_v15 = vld [vmem:[#allocation7 + $0x18] sm:$0xff]   ;;  %v480_v24 = vld [vmem:[#allocation7 + $0x20] sm:$0xff]   ;;  %v481_v25 = vld [vmem:[#allocation7 + $0x28] sm:$0xff]  }
  0x3c   :  { %416 = vmatmul.mubr.msk.bf16.vlgmr.msra.gmra.mrb[0].mxu0 %vm84_vm1, %v68_v3  ;;  %v372_v16 = vld [vmem:[%s721_s2] ss:$0 sm:$0xff]  ;;  %v482_v26 = vld [vmem:[#allocation7 + $0x30] sm:$0xff]  }
  0x3d   :  { %455 = vmatprep.mubr.msk.bf16.mxu0 %vm588_vm0, %v587_v0  ;;  %422 = vmatpush3.bf16.msra.mxu1 %v469_v5  ;;  %v483_v27 = vld [vmem:[#allocation7 + $0x38] sm:$0xff]  }
  0x3e   :  { %423 = vmatprep.subr.bf16.mxu1 %v587_v0  ;;  %440 = vmatpush3.bf16.msra.mxu0 %v476_v12  ;;  %v375_v28 = vld [vmem:[%s723_s4] ss:$0 sm:$0xff]  ;;  %s554_s4 = scalar_lea.vmem %s363_s20, 128 }
  0x3f   :  { %441 = vmatprep.subr.bf16.mxu0 %v587_v0  ;;  %v384_v36 = vld [vmem:[%s725_s6] ss:$0 sm:$0xff]  ;;  %p555_p10 = scmp.ne.s32.totalorder %s363_s20, %s554_s4  ;;  %p560_p12 = scmp.lt.s32.totalorder %s554_s4, %s554_s4 }
  0x41   :  { %424 = vmatpush3.bf16.msra.mxu1 %v470_v6  ;;  %p561_p13 = por %p560_p12, %p559_p11 }
  0x42   :  { %425 = vmatprep.subr.bf16.mxu1 %v587_v0  ;;  %442 = vmatpush3.bf16.msra.mxu0 %v477_v13 }
  0x43   :  { %443 = vmatprep.subr.bf16.mxu0 %v587_v0  ;;  %p562_p0 = pnand %p561_p13, %p555_p10 }
  0x45   :  { %426 = vmatpush3.bf16.msra.mxu1 %v471_v7 }
  0x46   :  { %427 = vmatprep.subr.bf16.mxu1 %v587_v0  ;;  %444 = vmatpush3.bf16.msra.mxu0 %v478_v14 }
  0x47   :  { %445 = vmatprep.subr.bf16.mxu0 %v587_v0 }
  0x49   :  { %428 = vmatpush3.bf16.msra.mxu1 %v472_v8 }
  0x4a   :  { %429 = vmatprep.subr.bf16.mxu1 %v587_v0  ;;  %446 = vmatpush3.bf16.msra.mxu0 %v479_v15 }
  0x4b   :  { %447 = vmatprep.subr.bf16.mxu0 %v587_v0 }
  0x4d   :  { %430 = vmatpush3.bf16.msra.mxu1 %v473_v9 }
  0x4e   :  { %431 = vmatprep.subr.bf16.mxu1 %v587_v0  ;;  %448 = vmatpush3.bf16.msra.mxu0 %v480_v24 }
  0x4f   :  { %449 = vmatprep.subr.bf16.mxu0 %v587_v0 }
  0x51   :  { %432 = vmatpush3.bf16.msra.mxu1 %v474_v10 }
  0x52   :  { %433 = vmatprep.subr.bf16.mxu1 %v587_v0  ;;  %450 = vmatpush3.bf16.msra.mxu0 %v481_v25 }
  0x53   :  { %451 = vmatprep.subr.bf16.mxu0 %v587_v0 }
  0x55   :  { %434 = vmatpush3.bf16.msra.mxu1 %v475_v11 }
  0x56   :  { %452 = vmatpush3.bf16.msra.mxu0 %v482_v26 }
  0x57   :  { %453 = vmatprep.subr.bf16.mxu0 %v587_v0 }
  0x5a   :  { %454 = vmatpush3.bf16.msra.mxu0 %v483_v27 }
 0x10f   :  { %v122_v17 = vpop.f32.mrb[0].mxu0 }
 0x110   :  { %v123_v18 = vadd.f32 %v372_v16, %v122_v17  ;;  %v417_v19 = vpop.f32.mrb[1].mxu0 }
 0x111   :  { %v125_v20 = vpop.f32.mrb[2].mxu0 }
 0x112   :  { %484 = vtanh.f32 %v123_v18  ;;  %v418_v21 = vpop.f32.mrb[3].mxu0 }
 0x11c   :  { %v485_v22 = vpop.eup %484 }
 0x11d   :  { %v129_v23 = vpack.c.bf16 %v485_v22, %v485_v22 }
 0x11f   :  { %436 = vmatmul.mubr.bf16.vlgmr.msra.gmra.mrb[0].mxu1 %v129_v23 }
 0x1f2   :  { %v235_v29 = vpop.f32.mrb[0].mxu1 }
 0x1f3   :  { %v236_v30 = vadd.f32 %v375_v28, %v235_v29  ;;  %v437_v31 = vpop.f32.mrb[1].mxu1 }
 0x1f4   :  { %v238_v32 = vpop.f32.mrb[2].mxu1 }
 0x1f5   :  { %486 = vtanh.f32 %v236_v30  ;;  %v438_v33 = vpop.f32.mrb[3].mxu1 }
 0x1ff   :  { %v487_v34 = vpop.eup %486 }
 0x200   :  { %v242_v35 = vpack.c.bf16 %v487_v34, %v487_v34 }
 0x202   :  { %456 = vmatmul.mubr.bf16.vlgmr.msra.gmra.mrb[4].mxu0 %v242_v35 }
 0x2d5   :  { %v348_v37 = vpop.f32.mrb[4].mxu0 }
 0x2d6   :  { %v349_v38 = vadd.f32 %v384_v36, %v348_v37  ;;  %v457_v39 = vpop.f32.mrb[5].mxu0 }
 0x2d7   :  { %v351_v40 = vpop.f32.mrb[6].mxu0 }
 0x2d8   :  { %v458_v41 = vpop.f32.mrb[7].mxu0  ;;  %355 = vst.msk [vmem:[#allocation8] sm:$0xff] %vm354_vm2, %v349_v38 }
 0x2d9   :  { %565 = shalt.err (!%p562_p0)
}
 0x2da   :  { %s566_s6 = scalar_lea.hbm %s726_s7, 128 }
 0x2db   :  { %p567_p1 = scmp.ne.s32.totalorder %s726_s7, %s566_s6  ;;  %p570_p2 = scmp.lt.u32.totalorder %s566_s6, %s726_s7 }
 0x2dd   :  { %p572_p3 = pnand %p570_p2, %p567_p1 }
 0x2df   :  { %575 = shalt.err (!%p572_p3)
}
 0x2e0   :  { %365 = dma.vmem_to_hbm [thread:$0]  %s363_s20, 128, %s726_s7, [#allocation4]  }
 0x2e1   :  { %580 = dma.done.wait [#allocation4], 128  }
 0x2e2   :  { %581 = vsyncadd [#allocation4], 4294967168 }
 0x2e3   :  { %369 = vsyncpa [#allocation3], 1 }
 0x2e4   :  { %370 = vsyncpa [#allocation6], 1 }
 0x2e5   :  { %371 = vsyncpa [#allocation4], 1 }

</bundles_post_ra>
